<compile_context>
chip_gen: v6e
topology: v6e:2x2x1
jax: 0.10.0
libtpu: 0.0.40
codegen_flags: <defaults>
</compile_context>

<pallas_src>
import jax
import jax.numpy as jnp
from jax.experimental import pallas as pl
from jax.experimental.pallas import tpu as pltpu

C_PAD = 128  # lane-dense padded class dimension (one full vreg lane width)


def _round_up(x, m):
    return (x + m - 1) // m * m


def wide_and_deep_kernel(
    x_wide_ref,   # (TB, WIDE)     f32 (producer dtype; cast to bf16 in-kernel)
    x_deep_ref,   # (TB, IN)       f32
    w1_ref, b1_ref,          # (IN, H1) bf16, (1, H1) f32
    w2_ref, b2_ref,          # (H1, H2) bf16, (1, H2) f32
    wo_deep_ref,             # (H2, C_PAD)   bf16
    wo_wide_ref,             # (WIDE, C_PAD) bf16
    bo_ref,                  # (1, C_PAD)    f32 (padded classes carry -1e30)
    out_ref,                 # (TB, C_PAD)   bf16
):
    # In-kernel bf16 cast of the activations (cheap VPU work; avoids a separate
    # XLA cast pass over HBM in the wrapper).
    x_deep = x_deep_ref[...].astype(jnp.bfloat16)
    x_wide = x_wide_ref[...].astype(jnp.bfloat16)

    # Deep branch: Linear -> ReLU -> Linear -> ReLU.
    # bf16 MXU matmuls, f32 accumulation; elementwise math stays in f32.
    h = jnp.dot(x_deep, w1_ref[...], preferred_element_type=jnp.float32)
    h = jnp.maximum(h + b1_ref[...], 0.0).astype(jnp.bfloat16)
    h = jnp.dot(h, w2_ref[...], preferred_element_type=jnp.float32)
    h = jnp.maximum(h + b2_ref[...], 0.0).astype(jnp.bfloat16)

    # concat([deep, wide]) @ W_out  ==  deep @ W_out[:H2] + wide @ W_out[H2:]
    logits = (
        jnp.dot(h, wo_deep_ref[...], preferred_element_type=jnp.float32)
        + jnp.dot(x_wide, wo_wide_ref[...], preferred_element_type=jnp.float32)
        + bo_ref[...]
    )

    # Softmax over the lane axis. Padded class columns have a -1e30 bias, so
    # exp underflows to exactly 0 and they do not perturb the real-class probs.
    m = jnp.max(logits, axis=1, keepdims=True)
    e = jnp.exp(logits - m)
    denom = jnp.sum(e, axis=1, keepdims=True)
    # approx reciprocal (EUP slot): rows sum to 1 to ~1e-3 relative accuracy —
    # fine for inference; documented deviation from exact normalization.
    probs = e * pl.reciprocal(denom, approx=True)
    # bf16 writeback halves the dominant (128-lane output) HBM traffic.
    out_ref[...] = probs.astype(out_ref.dtype)


def prepare_kernel_params(params):
    """One-time host-side prep: cast weights to bf16, pad classes to C_PAD."""
    c = params["bo"].shape[-1]
    assert c <= C_PAD
    pad_cols = lambda a: jnp.pad(a, ((0, 0), (0, C_PAD - c)))
    kparams = {
        "w1": params["w1"].astype(jnp.bfloat16),
        "b1": params["b1"].astype(jnp.float32),
        "w2": params["w2"].astype(jnp.bfloat16),
        "b2": params["b2"].astype(jnp.float32),
        "wo_deep": pad_cols(params["wo_deep"]).astype(jnp.bfloat16),
        "wo_wide": pad_cols(params["wo_wide"]).astype(jnp.bfloat16),
        # Padded class columns get a huge negative bias -> softmax prob 0.
        "bo": jnp.concatenate(
            [params["bo"].astype(jnp.float32),
             jnp.full((1, C_PAD - c), -1e30, jnp.float32)], axis=1),
    }
    return kparams, c


def _choose_tile_b(batch, tile_b):
    """Batch tile: multiple of 8, capped at the (sublane-rounded) batch."""
    full = _round_up(batch, 8)
    tb = min(tile_b, full)
    # v7x megacore: if a large batch fits in a single tile, split it in two so
    # dimension_semantics=("parallel",) can shard the grid across the 2 TCs.
    # (No effect on v5e/v6e, which have a single TensorCore.)
    if tb >= full and full >= 1024:
        tb = _round_up(pl.cdiv(full, 2), 8)
    return tb


def wide_and_deep_forward(x_wide, x_deep, kparams, num_classes, *, tile_b=1024):
    B = x_deep.shape[0]
    tb = _choose_tile_b(B, tile_b)
    # No batch padding: cdiv grid + Pallas partial-block masking on the tail.
    # VMEM is tiny at these widths (tb=1024: ~0.4 MiB of activation + output
    # buffers double-buffered), far inside every generation's scoped default.
    grid = (pl.cdiv(B, tb),)

    args = (
        x_wide, x_deep,
        kparams["w1"], kparams["b1"],
        kparams["w2"], kparams["b2"],
        kparams["wo_deep"], kparams["wo_wide"], kparams["bo"],
    )
    batch_spec = lambda a: pl.BlockSpec((tb, a.shape[1]), lambda i: (i, 0))
    const_spec = lambda a: pl.BlockSpec(a.shape, lambda i: (0, 0))
    in_specs = [batch_spec(x_wide), batch_spec(x_deep)]
    in_specs += [const_spec(a) for a in args[2:]]

    out = pl.pallas_call(
        wide_and_deep_kernel,
        out_shape=jax.ShapeDtypeStruct((B, C_PAD), jnp.bfloat16),
        grid=grid,
        in_specs=in_specs,
        out_specs=pl.BlockSpec((tb, C_PAD), lambda i: (i, 0)),
        compiler_params=pltpu.CompilerParams(
            dimension_semantics=("parallel",),
        ),
    )(*args)
    # Strip padded class lanes (exactly 0 probability there by construction).
    return out[:, :num_classes]


def init_params(key, input_dim, wide_dim, hidden_layers, num_classes):
    ks = jax.random.split(key, 6)
    h1, h2 = hidden_layers

    def lin(k, fan_in, fan_out):
        return (jax.random.normal(k, (fan_in, fan_out), jnp.float32)
                * (1.0 / jnp.sqrt(fan_in)))

    w_out = lin(ks[4], h2 + wide_dim, num_classes)
    return {
        "w1": lin(ks[0], input_dim, h1),
        "b1": jax.random.normal(ks[1], (1, h1), jnp.float32) * 0.01,
        "w2": lin(ks[2], h1, h2),
        "b2": jax.random.normal(ks[3], (1, h2), jnp.float32) * 0.01,
        # output weight split into deep / wide halves (concat equivalence)
        "wo_deep": w_out[:h2, :],
        "wo_wide": w_out[h2:, :],
        "bo": jax.random.normal(ks[5], (1, num_classes), jnp.float32) * 0.01,
    }


def _reference(x_wide, x_deep, params):
    h = jnp.maximum(x_deep @ params["w1"] + params["b1"], 0.0)
    h = jnp.maximum(h @ params["w2"] + params["b2"], 0.0)
    logits = h @ params["wo_deep"] + x_wide @ params["wo_wide"] + params["bo"]
    return jax.nn.softmax(logits, axis=1)


if __name__ == "__main__":
    # Module config: input_dim=32, wide_dim=16, hidden=[64, 32], dropout=0
    # (inference path -> Dropout is a no-op), num_classes=4, batch=8.
    INPUT_DIM, WIDE_DIM, HIDDEN, NUM_CLASSES, BATCH = 32, 16, (64, 32), 4, 8

    key = jax.random.PRNGKey(0)
    k_params, k_wide, k_deep = jax.random.split(key, 3)

    params = init_params(k_params, INPUT_DIM, WIDE_DIM, HIDDEN, NUM_CLASSES)
    kparams, n_classes = prepare_kernel_params(params)

    x_wide = jax.random.normal(k_wide, (BATCH, WIDE_DIM), jnp.float32)
    x_deep = jax.random.normal(k_deep, (BATCH, INPUT_DIM), jnp.float32)

    out = wide_and_deep_forward(x_wide, x_deep, kparams, n_classes)
    out = jax.block_until_ready(out)
    assert out.shape == (BATCH, NUM_CLASSES)
    assert out.dtype == jnp.bfloat16

    ref = _reference(x_wide, x_deep, params)
    out_f32 = out.astype(jnp.float32)
    assert jnp.allclose(out_f32, ref, atol=2e-2), float(jnp.max(jnp.abs(out_f32 - ref)))
    # rows sum to ~1 (padded class lanes contribute exactly 0; bf16 + approx
    # reciprocal leave ~0.5% slack)
    assert jnp.allclose(jnp.sum(out_f32, axis=1), 1.0, atol=2e-2)

    # Exercise the multi-step grid + partial last block path (200 = 128 + 72
    # valid rows in the tail block); production callers keep the larger default
    # tile — this small tile is for test coverage only.
    B2 = 200
    k2w, k2d = jax.random.split(jax.random.PRNGKey(1))
    xw2 = jax.random.normal(k2w, (B2, WIDE_DIM), jnp.float32)
    xd2 = jax.random.normal(k2d, (B2, INPUT_DIM), jnp.float32)
    out2 = jax.block_until_ready(
        wide_and_deep_forward(xw2, xd2, kparams, n_classes, tile_b=128))
    assert out2.shape == (B2, NUM_CLASSES)
    assert jnp.allclose(out2.astype(jnp.float32), _reference(xw2, xd2, params),
                        atol=2e-2)

    print("KERNEL_OK")
</pallas_src>

<mosaic_0001>
module attributes {stable_mosaic.version = 11 : i64} {
  func.func @wide_and_deep_kernel(%arg0: i32, %arg1: memref<8x16xf32, #tpu.memory_space<vmem>>, %arg2: memref<8x32xf32, #tpu.memory_space<vmem>>, %arg3: memref<32x64xbf16, #tpu.memory_space<vmem>>, %arg4: memref<1x64xf32, #tpu.memory_space<vmem>>, %arg5: memref<64x32xbf16, #tpu.memory_space<vmem>>, %arg6: memref<1x32xf32, #tpu.memory_space<vmem>>, %arg7: memref<32x128xbf16, #tpu.memory_space<vmem>>, %arg8: memref<16x128xbf16, #tpu.memory_space<vmem>>, %arg9: memref<1x128xf32, #tpu.memory_space<vmem>>, %arg10: memref<8x128xbf16, #tpu.memory_space<vmem>>) attributes {dimension_semantics = [#tpu.dimension_semantics<parallel>], iteration_bounds = array<i64: 1>, scalar_prefetch = 0 : i64, scratch_operands = 0 : i64, tpu.core_type = #tpu.core_type<tc>, window_params = [{transform_indices = @transform_0, window_bounds = array<i64: 8, 16>}, {transform_indices = @transform_1, window_bounds = array<i64: 8, 32>}, {pipeline_mode = #tpu.pipeline_mode<synchronous>, transform_indices = @transform_2, window_bounds = array<i64: 32, 64>}, {pipeline_mode = #tpu.pipeline_mode<synchronous>, transform_indices = @transform_3, window_bounds = array<i64: 1, 64>}, {pipeline_mode = #tpu.pipeline_mode<synchronous>, transform_indices = @transform_4, window_bounds = array<i64: 64, 32>}, {pipeline_mode = #tpu.pipeline_mode<synchronous>, transform_indices = @transform_5, window_bounds = array<i64: 1, 32>}, {pipeline_mode = #tpu.pipeline_mode<synchronous>, transform_indices = @transform_6, window_bounds = array<i64: 32, 128>}, {pipeline_mode = #tpu.pipeline_mode<synchronous>, transform_indices = @transform_7, window_bounds = array<i64: 16, 128>}, {pipeline_mode = #tpu.pipeline_mode<synchronous>, transform_indices = @transform_8, window_bounds = array<i64: 1, 128>}, {transform_indices = @transform_9, window_bounds = array<i64: 8, 128>}]} {
    %c0 = arith.constant 0 : index
    %c0_0 = arith.constant 0 : index
    %0 = vector.load %arg2[%c0, %c0_0] : memref<8x32xf32, #tpu.memory_space<vmem>>, vector<8x32xf32>
    %1 = arith.truncf %0 : vector<8x32xf32> to vector<8x32xbf16>
    %c0_1 = arith.constant 0 : index
    %c0_2 = arith.constant 0 : index
    %2 = vector.load %arg1[%c0_1, %c0_2] : memref<8x16xf32, #tpu.memory_space<vmem>>, vector<8x16xf32>
    %3 = arith.truncf %2 : vector<8x16xf32> to vector<8x16xbf16>
    %c0_3 = arith.constant 0 : index
    %c0_4 = arith.constant 0 : index
    %4 = vector.load %arg3[%c0_3, %c0_4] : memref<32x64xbf16, #tpu.memory_space<vmem>>, vector<32x64xbf16>
    %cst = arith.constant dense<0.000000e+00> : vector<8x64xf32>
    %5 = tpu.matmul %1, %4, %cst {dimension_numbers = #tpu.dot_dimension_numbers<[1], [0], [0], [1], [0, 0, 1, 1], [], []>} : vector<8x32xbf16>, vector<32x64xbf16>, vector<8x64xf32> -> vector<8x64xf32>
    %c0_5 = arith.constant 0 : index
    %c0_6 = arith.constant 0 : index
    %6 = vector.load %arg4[%c0_5, %c0_6] : memref<1x64xf32, #tpu.memory_space<vmem>>, vector<1x64xf32>
    %7 = vector.broadcast %6 : vector<1x64xf32> to vector<8x64xf32>
    %8 = arith.addf %5, %7 : vector<8x64xf32>
    %cst_7 = arith.constant 0.000000e+00 : f32
    %9 = vector.broadcast %cst_7 : f32 to vector<8x64xf32>
    %10 = arith.maximumf %8, %9 : vector<8x64xf32>
    %11 = arith.truncf %10 : vector<8x64xf32> to vector<8x64xbf16>
    %c0_8 = arith.constant 0 : index
    %c0_9 = arith.constant 0 : index
    %12 = vector.load %arg5[%c0_8, %c0_9] : memref<64x32xbf16, #tpu.memory_space<vmem>>, vector<64x32xbf16>
    %cst_10 = arith.constant dense<0.000000e+00> : vector<8x32xf32>
    %13 = tpu.matmul %11, %12, %cst_10 {dimension_numbers = #tpu.dot_dimension_numbers<[1], [0], [0], [1], [0, 0, 1, 1], [], []>} : vector<8x64xbf16>, vector<64x32xbf16>, vector<8x32xf32> -> vector<8x32xf32>
    %c0_11 = arith.constant 0 : index
    %c0_12 = arith.constant 0 : index
    %14 = vector.load %arg6[%c0_11, %c0_12] : memref<1x32xf32, #tpu.memory_space<vmem>>, vector<1x32xf32>
    %15 = vector.broadcast %14 : vector<1x32xf32> to vector<8x32xf32>
    %16 = arith.addf %13, %15 : vector<8x32xf32>
    %cst_13 = arith.constant 0.000000e+00 : f32
    %17 = vector.broadcast %cst_13 : f32 to vector<8x32xf32>
    %18 = arith.maximumf %16, %17 : vector<8x32xf32>
    %19 = arith.truncf %18 : vector<8x32xf32> to vector<8x32xbf16>
    %c0_14 = arith.constant 0 : index
    %c0_15 = arith.constant 0 : index
    %20 = vector.load %arg7[%c0_14, %c0_15] : memref<32x128xbf16, #tpu.memory_space<vmem>>, vector<32x128xbf16>
    %cst_16 = arith.constant dense<0.000000e+00> : vector<8x128xf32>
    %21 = tpu.matmul %19, %20, %cst_16 {dimension_numbers = #tpu.dot_dimension_numbers<[1], [0], [0], [1], [0, 0, 1, 1], [], []>} : vector<8x32xbf16>, vector<32x128xbf16>, vector<8x128xf32> -> vector<8x128xf32>
    %c0_17 = arith.constant 0 : index
    %c0_18 = arith.constant 0 : index
    %22 = vector.load %arg8[%c0_17, %c0_18] : memref<16x128xbf16, #tpu.memory_space<vmem>>, vector<16x128xbf16>
    %cst_19 = arith.constant dense<0.000000e+00> : vector<8x128xf32>
    %23 = tpu.matmul %3, %22, %cst_19 {dimension_numbers = #tpu.dot_dimension_numbers<[1], [0], [0], [1], [0, 0, 1, 1], [], []>} : vector<8x16xbf16>, vector<16x128xbf16>, vector<8x128xf32> -> vector<8x128xf32>
    %24 = arith.addf %21, %23 : vector<8x128xf32>
    %c0_20 = arith.constant 0 : index
    %c0_21 = arith.constant 0 : index
    %25 = vector.load %arg9[%c0_20, %c0_21] : memref<1x128xf32, #tpu.memory_space<vmem>>, vector<1x128xf32>
    %26 = vector.broadcast %25 : vector<1x128xf32> to vector<8x128xf32>
    %27 = arith.addf %24, %26 : vector<8x128xf32>
    %cst_22 = arith.constant dense<0xFF800000> : vector<8xf32>
    %28 = vector.multi_reduction <maximumf>, %27, %cst_22 [1] : vector<8x128xf32> to vector<8xf32>
    %29 = vector.shape_cast %28 : vector<8xf32> to vector<8x1xf32>
    %30 = vector.broadcast %29 : vector<8x1xf32> to vector<8x128xf32>
    %31 = arith.subf %27, %30 : vector<8x128xf32>
    %32 = math.exp %31 : vector<8x128xf32>
    %cst_23 = arith.constant dense<0.000000e+00> : vector<8xf32>
    %33 = vector.multi_reduction <add>, %32, %cst_23 [1] : vector<8x128xf32> to vector<8xf32>
    %34 = vector.shape_cast %33 : vector<8xf32> to vector<8x1xf32>
    %35 = tpu.reciprocal %34 {approx = true} : vector<8x1xf32> -> vector<8x1xf32>
    %36 = vector.broadcast %35 : vector<8x1xf32> to vector<8x128xf32>
    %37 = arith.mulf %32, %36 : vector<8x128xf32>
    %38 = arith.truncf %37 : vector<8x128xf32> to vector<8x128xbf16>
    %c0_24 = arith.constant 0 : index
    %c0_25 = arith.constant 0 : index
    %39 = vector.load %arg10[%c0_24, %c0_25] : memref<8x128xbf16, #tpu.memory_space<vmem>>, vector<8x128xbf16>
    tpu.vector_store %arg10[%c0_24, %c0_25], %38 {strides = array<i32>} : memref<8x128xbf16, #tpu.memory_space<vmem>>, vector<8x128xbf16>,
    return
  }
  func.func @transform_0(%arg0: i32) -> (i32, i32) {
    %c0_i32 = arith.constant 0 : i32
    %c0_i32_0 = arith.constant 0 : i32
    return %arg0, %c0_i32 : i32, i32
  }
  func.func @transform_1(%arg0: i32) -> (i32, i32) {
    %c0_i32 = arith.constant 0 : i32
    %c0_i32_0 = arith.constant 0 : i32
    return %arg0, %c0_i32 : i32, i32
  }
  func.func @transform_2(%arg0: i32) -> (i32, i32) {
    %c0_i32 = arith.constant 0 : i32
    %c0_i32_0 = arith.constant 0 : i32
    %c0_i32_1 = arith.constant 0 : i32
    return %c0_i32, %c0_i32_0 : i32, i32
  }
  func.func @transform_3(%arg0: i32) -> (i32, i32) {
    %c0_i32 = arith.constant 0 : i32
    %c0_i32_0 = arith.constant 0 : i32
    %c0_i32_1 = arith.constant 0 : i32
    return %c0_i32, %c0_i32_0 : i32, i32
  }
  func.func @transform_4(%arg0: i32) -> (i32, i32) {
    %c0_i32 = arith.constant 0 : i32
    %c0_i32_0 = arith.constant 0 : i32
    %c0_i32_1 = arith.constant 0 : i32
    return %c0_i32, %c0_i32_0 : i32, i32
  }
  func.func @transform_5(%arg0: i32) -> (i32, i32) {
    %c0_i32 = arith.constant 0 : i32
    %c0_i32_0 = arith.constant 0 : i32
    %c0_i32_1 = arith.constant 0 : i32
    return %c0_i32, %c0_i32_0 : i32, i32
  }
  func.func @transform_6(%arg0: i32) -> (i32, i32) {
    %c0_i32 = arith.constant 0 : i32
    %c0_i32_0 = arith.constant 0 : i32
    %c0_i32_1 = arith.constant 0 : i32
    return %c0_i32, %c0_i32_0 : i32, i32
  }
  func.func @transform_7(%arg0: i32) -> (i32, i32) {
    %c0_i32 = arith.constant 0 : i32
    %c0_i32_0 = arith.constant 0 : i32
    %c0_i32_1 = arith.constant 0 : i32
    return %c0_i32, %c0_i32_0 : i32, i32
  }
  func.func @transform_8(%arg0: i32) -> (i32, i32) {
    %c0_i32 = arith.constant 0 : i32
    %c0_i32_0 = arith.constant 0 : i32
    %c0_i32_1 = arith.constant 0 : i32
    return %c0_i32, %c0_i32_0 : i32, i32
  }
  func.func @transform_9(%arg0: i32) -> (i32, i32) {
    %c0_i32 = arith.constant 0 : i32
    %c0_i32_0 = arith.constant 0 : i32
    return %arg0, %c0_i32 : i32, i32
  }
}

</mosaic_0001>

<bundles_post_ra>
// kernel: tpu_custom_call.1
= control target key start
LH: loop header
LB: loop body
LE: loop exit
PB: predicated region body
PF: predicated region fallthrough
CT: control target
= control target key end

     0   :  { %14 = vsyncpa [#allocation3], 0  ;;  %s578_s0 = inlined_call_operand.vmem [shape: f32[8,16], index: 0, kind: input, shape index: {}]   ;;  %s579_s1 = inlined_call_operand.vmem [shape: f32[8,32], index: 1, kind: input, shape index: {}]   ;;  %s580_s2 = inlined_call_operand.vmem [shape: bf16[32,64], index: 2, kind: input, shape index: {}]   ;;  %s581_s3 = inlined_call_operand.vmem [shape: f32[1,64], index: 3, kind: input, shape index: {}]   ;;  %s582_s4 = inlined_call_operand.vmem [shape: bf16[64,32], index: 4, kind: input, shape index: {}]   ;;  %s583_s5 = inlined_call_operand.hbm [shape: f32[1,32], index: 5, kind: input, shape index: {}]   ;;  %s584_s6 = inlined_call_operand.vmem [shape: bf16[32,128], index: 6, kind: input, shape index: {}]   ;;  %s585_s7 = inlined_call_operand.vmem [shape: bf16[16,128], index: 7, kind: input, shape index: {}]   ;;  %s586_s8 = inlined_call_operand.vmem [shape: f32[1,128], index: 8, kind: input, shape index: {}]   ;;  %s587_s9 = inlined_call_operand.hbm [shape: bf16[8,128], index: 9, kind: output, shape index: {}]  }
   0x1   :  { %15 = vsyncpa [#allocation4], 0  ;;  %s473_s30 = smov [#allocation2]  }
   0x2   :  { %s32_s10 = sshll.u32 %s473_s30, 4  ;;  %s33_s10 = int_to_ptr.vmem [resolvable:$true] %s32_s10 }
   0x3   :  { %s437_s11 = scalar_lea.vmem %s33_s10, 16  ;;  %s441_s12 = scalar_lea.vmem %s33_s10, 32 }
   0x4   :  { %p438_p0 = scmp.ne.s32.totalorder %s33_s10, %s437_s11  ;;  %p442_p1 = scmp.lt.s32.totalorder %s33_s10, %s33_s10 }
   0x5   :  { %p443_p2 = scmp.lt.s32.totalorder %s441_s12, %s437_s11 }
   0x7   :  { %p444_p3 = por %p443_p2, %p442_p1 }
   0x9   :  { %p445_p4 = pnand %p444_p3, %p438_p0 }
   0xb   :  { %448 = shalt.err (!%p445_p4)
}
   0xc   :  { %35 = dma.hbm_to_vmem [thread:$0]  %s583_s5, 16, %s33_s10, [#allocation3]  }
   0xd   :  { %469 = dma.done.wait [#allocation3], 16  }
   0xe   :  { %470 = vsyncadd [#allocation3], 4294967280  ;;  %v474_v0 = vmov 0.0   ;;  %vm475_vm0 = vmmov 0   ;;  %v416_v1 = vld [vmem:[%s580_s2 + $0x8] sm:$0xff]   ;;  %v417_v2 = vld [vmem:[%s580_s2] sm:$0xff]  }
   0xf   :  { %378 = vmatprep.subr.bf16.mxu0 %v474_v0  ;;  %382 = vmatprep.mubr.msk.bf16.mxu0 %vm475_vm0, %v474_v0  ;;  %v46_v3 = vld [vmem:[%s579_s1] sm:$0xff]  ;;  %v418_v4 = vld [vmem:[%s582_s4 + $0x18] sm:$0xff]   ;;  %vm73_vm1 = vcmask 261120   ;;  %v419_v5 = vld [vmem:[%s582_s4 + $0x10] sm:$0xff]   ;;  %vm216_vm2 = vcmask 130048   ;;  %vm158_vm3 = vcmask 523264  }
  0x10   :  { %386 = vmatprep.subr.bf16.mxu1 %v474_v0  ;;  %394 = vmatprep.mubr.msk.bf16.mxu1 %vm475_vm0, %v474_v0  ;;  %v47_v6 = vpack.c.bf16 %v46_v3, %v46_v3  ;;  %v420_v7 = vld [vmem:[%s582_s4 + $0x8] sm:$0xff]   ;;  %v421_v8 = vld [vmem:[%s582_s4] sm:$0xff]  }
  0x11   :  { %379 = vmatpush3.bf16.msra.mxu0 %v416_v1  ;;  %387 = vmatpush3.bf16.msra.mxu1 %v418_v4  ;;  %v422_v9 = vld [vmem:[%s585_s7] sm:$0xff]   ;;  %v423_v12 = vld [vmem:[%s584_s6 + $0x8] sm:$0xff]  }
  0x12   :  { %380 = vmatprep.subr.bf16.mxu0 %v474_v0  ;;  %388 = vmatprep.subr.bf16.mxu1 %v474_v0  ;;  %v48_v10 = vld [vmem:[%s578_s0] sm:$0xff] }
  0x13   :  { %v49_v11 = vpack.c.bf16 %v48_v10, %v48_v10  ;;  %v349_v13 = vld [vmem:[%s581_s3] ss:$0 sm:$0xff] }
  0x14   :  { %v424_v21 = vld [vmem:[%s584_s6] sm:$0xff]   ;;  %s476_s6 = smov [#allocation5]  }
  0x15   :  { %381 = vmatpush3.bf16.msra.mxu0 %v417_v2  ;;  %389 = vmatpush3.bf16.msra.mxu1 %v419_v5  ;;  %v353_v26 = vld [vmem:[#allocation2] ss:$0 sm:$0xff]  ;;  %s340_s13 = sshll.u32 %s476_s6, 4  ;;  %s341_s13 = int_to_ptr.vmem [resolvable:$true] %s340_s13 }
  0x16   :  { %398 = vmatprep.subr.bf16.mxu0 %v474_v0  ;;  %390 = vmatprep.subr.bf16.mxu1 %v474_v0  ;;  %v364_v35 = vld [vmem:[%s586_s8] ss:$0 sm:$0xff]  ;;  %s449_s8 = scalar_lea.vmem %s341_s13, 64  ;;  %p454_p6 = scmp.lt.s32.totalorder %s341_s13, %s341_s13 }
  0x17   :  { %p450_p5 = scmp.ne.s32.totalorder %s341_s13, %s449_s8  ;;  %p455_p7 = scmp.lt.s32.totalorder %s449_s8, %s449_s8 }
  0x18   :  { %383 = vmatmul.mubr.msk.bf16.vlgmr.msra.gmra.mxu0 %vm73_vm1, %v47_v6 }
  0x19   :  { %400 = vmatprep.mubr.msk.bf16.mxu0 %vm475_vm0, %v474_v0  ;;  %391 = vmatpush3.bf16.msra.mxu1 %v420_v7  ;;  %p456_p8 = por %p455_p7, %p454_p6 }
  0x1a   :  { %392 = vmatprep.subr.bf16.mxu1 %v474_v0  ;;  %399 = vmatpush3.bf16.msra.mxu0 %v422_v9 }
  0x1b   :  { %404 = vmatprep.subr.bf16.mxu0 %v474_v0  ;;  %p457_p9 = pnand %p456_p8, %p450_p5 }
  0x1d   :  { %393 = vmatpush3.bf16.msra.mxu1 %v421_v8 }
  0x20   :  { %401 = vmatmul.mubr.msk.bf16.vlgmr.msra.gmra.mxu0 %vm216_vm2, %v49_v11 }
  0x21   :  { %405 = vmatpush3.bf16.msra.mxu0 %v423_v12  ;;  %408 = vmatprep.mubr.msk.bf16.mxu0 %vm475_vm0, %v474_v0 }
  0x22   :  { %406 = vmatprep.subr.bf16.mxu0 %v474_v0 }
  0x25   :  { %407 = vmatpush3.bf16.msra.mxu0 %v424_v21 }
  0xd8   :  { %v111_v14 = vpop.f32.mrf.mxu0 }
  0xd9   :  { %v112_v15 = vadd.f32 %v349_v13, %v111_v14 }
  0xda   :  { %v384_v16 = vpop.f32.mrf.mxu0 }
  0xdb   :  { %v117_v17 = vmax.f32 %v112_v15, 0.0 }
  0xdc   :  { %v114_v18 = vpop.f32.mrf.mxu0 }
  0xdd   :  { %v118_v19 = vpack.c.bf16 %v117_v17, %v117_v17 }
  0xde   :  { %v385_v20 = vpop.f32.mrf.mxu0 }
  0xdf   :  { %395 = vmatmul.mubr.msk.bf16.vlgmr.msra.gmra.mxu1 %vm158_vm3, %v118_v19 }
  0xe0   :  { %v254_v22 = vpop.f32.mrf.mxu0 }
  0xe2   :  { %v402_v23 = vpop.f32.mrf.mxu0 }
  0xe4   :  { %v257_v24 = vpop.f32.mrf.mxu0 }
  0xe6   :  { %v403_v25 = vpop.f32.mrf.mxu0 }
 0x19f   :  { %v196_v27 = vpop.f32.mrf.mxu1 }
 0x1a0   :  { %v197_v28 = vadd.f32 %v353_v26, %v196_v27 }
 0x1a1   :  { %v396_v29 = vpop.f32.mrf.mxu1 }
 0x1a2   :  { %v202_v30 = vmax.f32 %v197_v28, 0.0 }
 0x1a3   :  { %v199_v31 = vpop.f32.mrf.mxu1 }
 0x1a4   :  { %v203_v32 = vpack.c.bf16 %v202_v30, %v202_v30 }
 0x1a5   :  { %v397_v33 = vpop.f32.mrf.mxu1 }
 0x1a6   :  { %409 = vmatmul.mubr.msk.bf16.vlgmr.msra.gmra.mxu0 %vm73_vm1, %v203_v32 }
 0x266   :  { %v309_v34 = vpop.f32.mrf.mxu0 }
 0x267   :  { %v310_v36 = vadd.f32 %v309_v34, %v254_v22 }
 0x268   :  { %v410_v37 = vpop.f32.mrf.mxu0 }
 0x269   :  { %v322_v38 = vadd.f32 %v364_v35, %v310_v36 }
 0x26a   :  { %v312_v39 = vpop.f32.mrf.mxu0 }
 0x26b   :  { %323 = vmax.xlane.f32.xlu0 %v322_v38 }
 0x26c   :  { %v411_v40 = vpop.f32.mrf.mxu0 }
 0x2f4   :  { %v324_v41 = vpop.xlane.xlu0 %323 }
 0x2f5   :  { %v325_v42 = vsub.f32 %v322_v38, %v324_v41 }
 0x2f7   :  { %v326_v43 = vmul.f32 1.442695, %v325_v42 }
 0x2f9   :  { %425 = vpow2.f32 %v326_v43 }
 0x306   :  { %v426_v44 = vpop.eup %425 }
 0x307   :  { %328 = vadd.xlane.f32.xlu0 %v426_v44 }
 0x390   :  { %v329_v45 = vpop.xlane.xlu0 %328 }
 0x391   :  { %427 = vrcp.f32 %v329_v45 }
 0x39e   :  { %v428_v46 = vpop.eup %427 }
 0x39f   :  { %v331_v47 = vmul.f32 %v428_v46, %v426_v44 }
 0x3a1   :  { %v332_v48 = vpack.c.bf16 %v331_v47, %v331_v47 }
 0x3a3   :  { %333 = vst [vmem:[#allocation5] sm:$0xf] %v332_v48 }
 0x3a4   :  { %460 = shalt.err (!%p457_p9)
}
 0x3a5   :  { %343 = dma.vmem_to_hbm [thread:$0]  %s341_s13, 64, %s587_s9, [#allocation4]  }
 0x3a6   :  { %471 = dma.done.wait [#allocation4], 64  }
 0x3a7   :  { %472 = vsyncadd [#allocation4], 4294967232 }
 0x3a8   :  { %347 = vsyncpa [#allocation3], 1 }
 0x3a9   :  { %348 = vsyncpa [#allocation4], 1 }

</bundles_post_ra>
